<compile_context>
chip_gen: v7x
topology: tpu7x:2x2x1
jax: 0.10.0
libtpu: 0.0.40
codegen_flags: <defaults>
</compile_context>

<pallas_src>
import jax
import jax.numpy as jnp
from jax.experimental import pallas as pl
from jax.experimental.pallas import tpu as pltpu

BN_EPS = 1e-5


# ------------------------------ Pallas kernel -------------------------------

def _factorized_reduce_kernel(x1_ref, x2_ref, w1_ref, w2_ref, shift_ref, o_ref):
    """Fused: two 1x1 stride-2 convs (MXU) -> channel concat (slice stores) -> BN shift.

    x1_ref / x2_ref : (1, Cin, TN) bf16   relu'd even/even and odd/odd samples
    w1_ref / w2_ref : (Ch, Cin)    bf16   conv weights with BN scale folded in
    shift_ref       : (Cout, 1)    f32    folded BN shift
    o_ref           : (1, Cout, TN) f32   NCHW-flattened, lane-dense output tile
    """
    ch = w1_ref.shape[0]
    shift = shift_ref[...]                                       # (Cout, 1)

    # 1x1 conv == matmul over channels; spatial stays dense on the lanes.
    y1 = jnp.dot(w1_ref[...], x1_ref[0], preferred_element_type=jnp.float32)
    y2 = jnp.dot(w2_ref[...], x2_ref[0], preferred_element_type=jnp.float32)

    # torch.cat along channels == two sublane-aligned slice stores (Ch is a
    # multiple of 8 at practical channel counts); no (Cout, TN) concat temp.
    o_ref[0, :ch, :] = (y1 + shift[:ch]).astype(o_ref.dtype)
    o_ref[0, ch:, :] = (y2 + shift[ch:]).astype(o_ref.dtype)


# ------------------------------ tiling helpers ------------------------------

def _round_up(x, m):
    return ((x + m - 1) // m) * m


def _bytes_per_spatial_column(c_in, c_out):
    # Double-buffered: two bf16 input tiles + one f32 output tile, per column.
    return 2 * (2 * c_in * 2) + 2 * (c_out * 4)


def _pick_spatial_tile(n, batch, c_in, c_out, *,
                       vmem_budget_bytes=24 << 20,
                       max_tile=16384,
                       target_grid_steps=8):
    """Lane-dense (multiple-of-128) spatial tile sized from a VMEM budget.

    Caps the tile so (a) the double-buffered footprint stays inside the budget
    (v7x has only 64 MiB physical VMEM even at large channel counts) and
    (b) the grid keeps >= target_grid_steps so both v7x TensorCores get work.
    """
    n128 = _round_up(n, 128)
    cap_budget = max(
        128, (vmem_budget_bytes // _bytes_per_spatial_column(c_in, c_out)) // 128 * 128)
    cap_steps = max(128, _round_up(pl.cdiv(batch * n128, target_grid_steps), 128))
    return min(n128, max_tile, cap_budget, cap_steps)


def _vmem_limit_bytes(c_in, c_out, tn):
    ch = c_out // 2
    used = (_bytes_per_spatial_column(c_in, c_out) * tn          # x1, x2, out (dbl-buf)
            + 2 * 2 * (ch * max(c_in, 128) * 2)                  # weights (dbl-buf, lane pad)
            + 2 * (c_out * 128 * 4))                             # shift  (dbl-buf, lane pad)
    return int(min(used + (8 << 20), 64 << 20))                  # headroom; v7x-safe cap


# ------------------------------- op wrapper ---------------------------------

def factorized_reduce(x_nchw, params):
    """FactorizedReduce forward (eval-mode BN).  x_nchw: (B, Cin, H, W) f32."""
    B, Cin, H, W = x_nchw.shape
    assert H % 2 == 0 and W % 2 == 0, "torch.cat in the module requires even H/W"
    w1, w2 = params["w1"], params["w2"]              # (Cout//2, Cin) f32
    scale, shift = params["scale"], params["shift"]  # (Cout,) f32
    Ch = w1.shape[0]
    Cout = 2 * Ch
    Ho, Wo = H // 2, W // 2
    N = Ho * Wo

    # BN scale folds into the (linear) convs: scale * (W @ x) == (scale*W) @ x.
    w1s = (scale[:Ch, None] * w1).astype(jnp.bfloat16)
    w2s = (scale[Ch:, None] * w2).astype(jnp.bfloat16)
    shift2d = shift.reshape(Cout, 1)

    # Stride-2 gathers (even/even for conv_1, odd/odd for conv_2). ReLU (in f32)
    # commutes with the subsample; relu + strided-slice + bf16 cast fuse into a
    # single XLA pass, so the kernel DMAs half of x at 2 bytes/element.
    x1 = jnp.maximum(x_nchw[:, :, 0::2, 0::2], 0.0).reshape(B, Cin, N).astype(jnp.bfloat16)
    x2 = jnp.maximum(x_nchw[:, :, 1::2, 1::2], 0.0).reshape(B, Cin, N).astype(jnp.bfloat16)

    TN = _pick_spatial_tile(N, B, Cin, Cout)
    Npad = TN * pl.cdiv(N, TN)
    if Npad != N:
        # Zero-pad to a lane-dense multiple of the tile (padded columns only see
        # the BN shift and are sliced off below) rather than one untiled block.
        x1 = jnp.pad(x1, ((0, 0), (0, 0), (0, Npad - N)))
        x2 = jnp.pad(x2, ((0, 0), (0, 0), (0, Npad - N)))

    grid = (B, Npad // TN)

    out = pl.pallas_call(
        _factorized_reduce_kernel,
        out_shape=jax.ShapeDtypeStruct((B, Cout, Npad), jnp.float32),
        grid=grid,
        in_specs=[
            pl.BlockSpec((1, Cin, TN), lambda b, j: (b, 0, j)),
            pl.BlockSpec((1, Cin, TN), lambda b, j: (b, 0, j)),
            pl.BlockSpec((Ch, Cin), lambda b, j: (0, 0)),
            pl.BlockSpec((Ch, Cin), lambda b, j: (0, 0)),
            pl.BlockSpec((Cout, 1), lambda b, j: (0, 0)),
        ],
        out_specs=pl.BlockSpec((1, Cout, TN), lambda b, j: (b, 0, j)),
        compiler_params=pltpu.CompilerParams(
            dimension_semantics=("parallel", "parallel"),
            vmem_limit_bytes=_vmem_limit_bytes(Cin, Cout, TN),
        ),
    )(x1, x2, w1s, w2s, shift2d)

    if Npad != N:
        out = out[:, :, :N]
    return out.reshape(B, Cout, Ho, Wo)              # already NCHW


# ------------------------------- parameters ---------------------------------

def init_factorized_reduce_params(key, C_in, C_out):
    assert C_out % 2 == 0
    Ch = C_out // 2
    k1, k2, k3, k4, k5, k6 = jax.random.split(key, 6)
    w1 = 0.3 * jax.random.normal(k1, (Ch, C_in), jnp.float32)
    w2 = 0.3 * jax.random.normal(k2, (Ch, C_in), jnp.float32)
    # BatchNorm2d(C_out, affine=True) in eval mode, folded to scale/shift.
    gamma = 1.0 + 0.1 * jax.random.normal(k3, (C_out,), jnp.float32)
    beta = 0.1 * jax.random.normal(k4, (C_out,), jnp.float32)
    running_mean = 0.1 * jax.random.normal(k5, (C_out,), jnp.float32)
    running_var = jnp.abs(1.0 + 0.1 * jax.random.normal(k6, (C_out,), jnp.float32))
    scale = gamma / jnp.sqrt(running_var + BN_EPS)
    shift = beta - running_mean * scale
    return {"w1": w1, "w2": w2, "scale": scale, "shift": shift}


# ---------------------------- pure-JAX reference ----------------------------

def factorized_reduce_reference(x_nchw, params):
    xr = jnp.maximum(x_nchw, 0.0)
    y1 = jnp.einsum("oc,bchw->bohw", params["w1"], xr[:, :, 0::2, 0::2],
                    precision=jax.lax.Precision.HIGHEST)
    y2 = jnp.einsum("oc,bchw->bohw", params["w2"], xr[:, :, 1::2, 1::2],
                    precision=jax.lax.Precision.HIGHEST)
    y = jnp.concatenate([y1, y2], axis=1)
    return (y * params["scale"][None, :, None, None]
            + params["shift"][None, :, None, None])


# ------------------------------------ main ----------------------------------

if __name__ == "__main__":
    # Small shapes; H=W=32 so the flattened output spatial axis Ho*Wo = 256 is
    # a multiple of 128 (lane-dense tiles/stores, no padding path exercised).
    B, C_in, C_out, H, W = 2, 16, 32, 32, 32

    key = jax.random.PRNGKey(0)
    kp, kx = jax.random.split(key)
    params = init_factorized_reduce_params(kp, C_in, C_out)
    x = jax.random.normal(kx, (B, C_in, H, W), jnp.float32)   # torch NCHW

    out = jax.block_until_ready(factorized_reduce(x, params))
    ref = jax.block_until_ready(factorized_reduce_reference(x, params))

    assert out.shape == (B, C_out, H // 2, W // 2), out.shape
    max_err = float(jnp.max(jnp.abs(out - ref)))
    # Tolerance documents the bf16 inputs / BN-scaled bf16 weights at the MXU
    # (f32 accumulation); observed error is ~1e-2, well inside 5e-2.
    assert jnp.allclose(out, ref, rtol=5e-2, atol=5e-2), f"max abs err {max_err}"
    print("KERNEL_OK")
</pallas_src>

<mosaic_0001>
module attributes {stable_mosaic.version = 11 : i64} {
  func.func @_factorized_reduce_kernel(%arg0: i32, %arg1: i32, %arg2: memref<1x16x128xbf16, #tpu.memory_space<vmem>>, %arg3: memref<1x16x128xbf16, #tpu.memory_space<vmem>>, %arg4: memref<16x16xbf16, #tpu.memory_space<vmem>>, %arg5: memref<16x16xbf16, #tpu.memory_space<vmem>>, %arg6: memref<32x1xf32, #tpu.memory_space<vmem>>, %arg7: memref<1x32x128xf32, #tpu.memory_space<vmem>>) attributes {dimension_semantics = [#tpu.dimension_semantics<parallel>, #tpu.dimension_semantics<parallel>], iteration_bounds = array<i64: 2, 2>, scalar_prefetch = 0 : i64, scratch_operands = 0 : i64, tpu.core_type = #tpu.core_type<tc>, window_params = [{transform_indices = @transform_0, window_bounds = array<i64: 1, 16, 128>}, {transform_indices = @transform_1, window_bounds = array<i64: 1, 16, 128>}, {pipeline_mode = #tpu.pipeline_mode<synchronous>, transform_indices = @transform_2, window_bounds = array<i64: 16, 16>}, {pipeline_mode = #tpu.pipeline_mode<synchronous>, transform_indices = @transform_3, window_bounds = array<i64: 16, 16>}, {pipeline_mode = #tpu.pipeline_mode<synchronous>, transform_indices = @transform_4, window_bounds = array<i64: 32, 1>}, {transform_indices = @transform_5, window_bounds = array<i64: 1, 32, 128>}]} {
    %c0 = arith.constant 0 : index
    %c0_0 = arith.constant 0 : index
    %0 = vector.load %arg6[%c0, %c0_0] : memref<32x1xf32, #tpu.memory_space<vmem>>, vector<32x1xf32>
    %c0_1 = arith.constant 0 : index
    %c0_2 = arith.constant 0 : index
    %1 = vector.load %arg4[%c0_1, %c0_2] : memref<16x16xbf16, #tpu.memory_space<vmem>>, vector<16x16xbf16>
    %c0_3 = arith.constant 0 : index
    %c0_4 = arith.constant 0 : index
    %c0_5 = arith.constant 0 : index
    %2 = vector.load %arg2[%c0_3, %c0_4, %c0_5] : memref<1x16x128xbf16, #tpu.memory_space<vmem>>, vector<1x16x128xbf16>
    %3 = vector.shape_cast %2 : vector<1x16x128xbf16> to vector<16x128xbf16>
    %cst = arith.constant dense<0.000000e+00> : vector<16x128xf32>
    %4 = tpu.matmul %1, %3, %cst {dimension_numbers = #tpu.dot_dimension_numbers<[1], [0], [0], [1], [0, 0, 1, 1], [], []>} : vector<16x16xbf16>, vector<16x128xbf16>, vector<16x128xf32> -> vector<16x128xf32>
    %c0_6 = arith.constant 0 : index
    %c0_7 = arith.constant 0 : index
    %5 = vector.load %arg5[%c0_6, %c0_7] : memref<16x16xbf16, #tpu.memory_space<vmem>>, vector<16x16xbf16>
    %c0_8 = arith.constant 0 : index
    %c0_9 = arith.constant 0 : index
    %c0_10 = arith.constant 0 : index
    %6 = vector.load %arg3[%c0_8, %c0_9, %c0_10] : memref<1x16x128xbf16, #tpu.memory_space<vmem>>, vector<1x16x128xbf16>
    %7 = vector.shape_cast %6 : vector<1x16x128xbf16> to vector<16x128xbf16>
    %cst_11 = arith.constant dense<0.000000e+00> : vector<16x128xf32>
    %8 = tpu.matmul %5, %7, %cst_11 {dimension_numbers = #tpu.dot_dimension_numbers<[1], [0], [0], [1], [0, 0, 1, 1], [], []>} : vector<16x16xbf16>, vector<16x128xbf16>, vector<16x128xf32> -> vector<16x128xf32>
    %9 = vector.extract_strided_slice %0 {offsets = [0, 0], sizes = [16, 1], strides = [1, 1]} : vector<32x1xf32> to vector<16x1xf32>
    %10 = vector.broadcast %9 : vector<16x1xf32> to vector<16x128xf32>
    %11 = arith.addf %4, %10 : vector<16x128xf32>
    %c0_12 = arith.constant 0 : index
    %c0_13 = arith.constant 0 : index
    %c0_14 = arith.constant 0 : index
    %12 = vector.load %arg7[%c0_12, %c0_13, %c0_14] : memref<1x32x128xf32, #tpu.memory_space<vmem>>, vector<1x16x128xf32>
    %13 = vector.shape_cast %12 : vector<1x16x128xf32> to vector<16x128xf32>
    %14 = vector.shape_cast %11 : vector<16x128xf32> to vector<1x16x128xf32>
    tpu.vector_store %arg7[%c0_12, %c0_13, %c0_14], %14 {strides = array<i32>} : memref<1x32x128xf32, #tpu.memory_space<vmem>>, vector<1x16x128xf32>,
    %15 = vector.extract_strided_slice %0 {offsets = [16, 0], sizes = [16, 1], strides = [1, 1]} : vector<32x1xf32> to vector<16x1xf32>
    %16 = vector.broadcast %15 : vector<16x1xf32> to vector<16x128xf32>
    %17 = arith.addf %8, %16 : vector<16x128xf32>
    %c0_15 = arith.constant 0 : index
    %c16 = arith.constant 16 : index
    %c0_16 = arith.constant 0 : index
    %18 = vector.load %arg7[%c0_15, %c16, %c0_16] : memref<1x32x128xf32, #tpu.memory_space<vmem>>, vector<1x16x128xf32>
    %19 = vector.shape_cast %18 : vector<1x16x128xf32> to vector<16x128xf32>
    %20 = vector.shape_cast %17 : vector<16x128xf32> to vector<1x16x128xf32>
    tpu.vector_store %arg7[%c0_15, %c16, %c0_16], %20 {strides = array<i32>} : memref<1x32x128xf32, #tpu.memory_space<vmem>>, vector<1x16x128xf32>,
    return
  }
  func.func @transform_0(%arg0: i32, %arg1: i32) -> (i32, i32, i32) {
    %c0_i32 = arith.constant 0 : i32
    %c0_i32_0 = arith.constant 0 : i32
    return %arg0, %c0_i32, %arg1 : i32, i32, i32
  }
  func.func @transform_1(%arg0: i32, %arg1: i32) -> (i32, i32, i32) {
    %c0_i32 = arith.constant 0 : i32
    %c0_i32_0 = arith.constant 0 : i32
    return %arg0, %c0_i32, %arg1 : i32, i32, i32
  }
  func.func @transform_2(%arg0: i32, %arg1: i32) -> (i32, i32) {
    %c0_i32 = arith.constant 0 : i32
    %c0_i32_0 = arith.constant 0 : i32
    %c0_i32_1 = arith.constant 0 : i32
    return %c0_i32, %c0_i32_0 : i32, i32
  }
  func.func @transform_3(%arg0: i32, %arg1: i32) -> (i32, i32) {
    %c0_i32 = arith.constant 0 : i32
    %c0_i32_0 = arith.constant 0 : i32
    %c0_i32_1 = arith.constant 0 : i32
    return %c0_i32, %c0_i32_0 : i32, i32
  }
  func.func @transform_4(%arg0: i32, %arg1: i32) -> (i32, i32) {
    %c0_i32 = arith.constant 0 : i32
    %c0_i32_0 = arith.constant 0 : i32
    %c0_i32_1 = arith.constant 0 : i32
    return %c0_i32, %c0_i32_0 : i32, i32
  }
  func.func @transform_5(%arg0: i32, %arg1: i32) -> (i32, i32, i32) {
    %c0_i32 = arith.constant 0 : i32
    %c0_i32_0 = arith.constant 0 : i32
    return %arg0, %c0_i32, %arg1 : i32, i32, i32
  }
}

</mosaic_0001>

<bundles_post_ra>
// kernel: tpu_custom_call.1
= control target key start
LH: loop header
LB: loop body
LE: loop exit
PB: predicated region body
PF: predicated region fallthrough
CT: control target
= control target key end

     0   :  { %s1222_s0 = inlined_call_operand.vmem [shape: bf16[2,16,256], index: 0, kind: input, shape index: {}]   ;;  %s1223_s1 = inlined_call_operand.hbm [shape: bf16[2,16,256], index: 1, kind: input, shape index: {}]   ;;  %s1224_s2 = inlined_call_operand.vmem [shape: bf16[16,16], index: 2, kind: input, shape index: {}]   ;;  %s1225_s3 = inlined_call_operand.hbm [shape: bf16[16,16], index: 3, kind: input, shape index: {}]   ;;  %s1226_s4 = inlined_call_operand.vmem [shape: f32[32,1], index: 4, kind: input, shape index: {}]   ;;  %s1227_s5 = inlined_call_operand.hbm [shape: f32[2,32,256], index: 5, kind: output, shape index: {}]  }
   0x1   :  { %1238 = sst [smem:[#allocation17_spill]] %s1225_s3 }
   0x2   :  { %10 = vsyncpa [#allocation4], 0 }
   0x3   :  { %12 = vsyncpa [#allocation4 + $0x1], 0 }
   0x4   :  { %13 = vsyncpa [#allocation7], 0 }
   0x5   :  { %14 = vsyncpa [#allocation5], 0 }
   0x6   :  { %16 = vsyncpa [#allocation5 + $0x1], 0  ;;  %s973_s18 = smov 0   ;;  %s975_s19 = smov 0  }
   0x7   :  { %s977_s20 = smov 0   ;;  %s979_s21 = smov 0  }
   0x8   :  { %s981_s22 = smov 0   ;;  %s983_s23 = smov 0  }
   0x9   :  { %s985_s24 = smov 0   ;;  %s987_s25 = smov 0  }
   0xa LB: > { %1239 = sst [smem:[#allocation12_spill]] %s899_s18  ;;  %s625_s26 = sadd.s32 4294967295, %s927_s25   ;;  %s927_s25 = sphi %s987_s25, %s22_s25   ;;  %s923_s24 = sphi %s985_s24, %s1270_s24   ;;  %s919_s23 = sphi %s983_s23, %s1269_s23   ;;  %s915_s22 = sphi %s981_s22, %s1268_s22   ;;  %s911_s21 = sphi %s979_s21, %s1267_s21   ;;  %s907_s20 = sphi %s977_s20, %s1266_s20   ;;  %s903_s19 = sphi %s975_s19, %s1265_s19   ;;  %s899_s18 = sphi %s973_s18, %s1264_s18  }
   0xb   : > { %s626_s27 = sadd.s32 4294967294, %s927_s25   ;;  %s31_s28 = sadd.s32 1, %s919_s23 }
   0xc   : > { %s34_s29 = sadd.s32 1, %s923_s24  ;;  %p32_p0 = scmp.ge.s32.totalorder %s31_s28, 2 }
   0xd   : > { %s43_s30 = sadd.s32 1, %s907_s20  ;;  %p50_p1 = scmp.ne.s32.totalorder %s907_s20, %s903_s19 }
   0xe   : > { %p51_p2 = scmp.eq.s32.totalorder %s927_s25, 0  ;;  %s1272_s28 = smov (%p32_p0, %s31_s28), 0 }
   0xf   : > { %1240 = sst [smem:[#allocation13_spill]] %s1272_s28  ;;  %s1274_s29 = smov (!%p32_p0, %s34_s29), %s923_s24 }
  0x10   : > { %s39_s6 = ssub.s32 %s919_s23, %s1272_s28  ;;  %p1026_p3 = por %p51_p2, %p50_p1 }
  0x11   : > { %p36_p4 = scmp.ge.s32.totalorder %s1274_s29, 2  ;;  %p84_p5 = scmp.ne.s32.totalorder %s903_s19, %s899_s18 }
  0x12   : > { %s1241_s7 = scalar_select %p1026_p3, 1, 0 }
  0x13   : > { %p1032_p6 = scmp.eq.s32.totalorder %s625_s26, 0  ;;  %p173_p7 = scmp.eq.s32.totalorder %s625_s26, 3 }
  0x14   : > { %s1276_s29 = smov (%p36_p4, %s1274_s29), 0  ;;  %p179_p10 = scmp.eq.s32.totalorder %s626_s27, 3 }
  0x15   : > { %s1242_s8 = scalar_select %p1032_p6, 1, 0 }
  0x16   : > { %1243 = sst [smem:[#allocation14_spill]] %s1276_s29  ;;  %p1040_p8 = por %p1032_p6, %p84_p5 }
  0x17   : > { %p1044_p9 = por %p173_p7, %p50_p1  ;;  %s38_s11 = ssub.s32 %s923_s24, %s1276_s29 }
  0x18   : > { %s1244_s9 = scalar_select %p1040_p8, 1, 0 }
  0x19   : > { %s1245_s10 = scalar_select %p1044_p9, 1, 0 }
  0x1a   : > { %s40_s12 = sor.u32 %s39_s6, %s38_s11  ;;  %p627_p11 = scmp.ge.s32.totalorder %s927_s25, 1 }
  0x1b   : > { %p41_p12 = scmp.eq.s32.totalorder %s40_s12, 0  ;;  %p1051_p13 = por %p179_p10, %p84_p5 }
  0x1c   : > { %p186_p0 = scmp.lt.s32.totalorder %s927_s25, 5  ;;  %s929_s16 = smov [#allocation6]  }
  0x1d   : > { %s1246_s13 = scalar_select %p1051_p13, 1, 0 }
  0x1e   : > { %s1057_s14 = scalar_select %p41_p12, %s907_s20, %s43_s30  }
  0x1f   : > { %1247 = sst [smem:[#allocation15_spill]] %s1246_s13  ;;  %p1059_p2 = pnand %p627_p11, %p186_p0 }
  0x20   : > { %1248 = sst [smem:[#allocation16_spill]] %s1057_s14  ;;  %s201_s17 = sshll.u32 %s929_s16, 4  ;;  %s202_s17 = int_to_ptr.vmem [resolvable:$true] %s201_s17 }
  0x21   : > { %s1249_s15 = scalar_select %p1059_p2, 1, 0 }
  0x22   : > { %p676_p1 = pneg %p1059_p2  ;;  %s1251_s3 = sld [smem:[#allocation17_spill]] }
  0x24   : > { %p1067_p4 = pnand %p676_p1, %p1032_p6 }
  0x26   : > { %p771_p7 = pneg %p1067_p4 }
  0x28   : > { %s769_s30 = scalar_lea.hbm %s1251_s3, 128 }
  0x29   : > { %p770_p5 = scmp.ne.s32.totalorder %s1251_s3, %s769_s30  ;;  %p776_p12 = scmp.lt.u32.totalorder %s769_s30, %s1251_s3 }
  0x2b   : > { %p772_p10 = pnand %p771_p7, %p770_p5 }
  0x2d   : > { %p773_p11 = pneg %p772_p10 }
  0x2f   : > { %p778_p0 = pnand %p776_p12, %p773_p11 }
  0x31   : > { %781 = shalt.err (!%p778_p0)
}
  0x32   : > { %s782_s28 = scalar_lea.vmem %s202_s17, 128  ;;  %p790_p6 = scmp.lt.s32.totalorder %s202_s17, %s202_s17 }
  0x33   : > { %p783_p1 = scmp.ne.s32.totalorder %s202_s17, %s782_s28  ;;  %p791_p8 = scmp.lt.s32.totalorder %s782_s28, %s782_s28 }
  0x35   : > { %p785_p13 = pnand %p783_p1, %p771_p7  ;;  %p792_p2 = por %p791_p8, %p790_p6 }
  0x37   : > { %p786_p9 = pneg %p785_p13 }
  0x39   : > { %p793_p3 = pnand %p792_p2, %p786_p9 }
  0x3b   : > { %796 = shalt.err (!%p793_p3)
}
  0x3c   : > { %s930_s27 = smov 64   ;;  %s931_s6 = smov 4  }
  0x3d   : > { %679 = dma.hbm_to_vmem [thread:$0]  (!%p1067_p4), %s1251_s3, 128, %s202_s17, [#allocation7], %s930_s27, %s930_s27, %s931_s6  }
  0x3e   : > { %p629_p5 = scmp.ge.s32.totalorder %s927_s25, 4 }
  0x3f   : > { %p1252_p10 = scmp.ne.s32.totalorder (!%p629_p5), %s1241_s7, 0 }
  0x40   : > { %214 = sbr.rel (%p629_p5) target bundleno = 107 (0x6b), region = 28 }
  0x47   : > { %217 = sbr.rel (!%p1252_p10) target bundleno = 78 (0x4e), region = 32  ;;  %s219_s28 = sand.u32 (%p1252_p10), 1, %s907_s20  }
  0x48   : > { %s631_s29 = sshll.u32 (%p1252_p10), %s923_s24, 2  ;;  %s630_s30 = sshll.u32 (%p1252_p10), %s219_s28, 3 }
  0x49   : > { %s223_s16 = sadd.s32 (%p1252_p10), %s919_s23, %s631_s29  ;;  %s221_s17 = scalar_lea.vmem (%p1252_p10), [#allocation2], %s630_s30 }
  0x4a   : > { %s632_s14 = sshll.u32 (%p1252_p10), %s223_s16, 2 }
  0x4b   : > { %s225_s18 = scalar_lea.vmem (%p1252_p10), %s1222_s0, %s632_s14 }
  0x4c   : > { %v241_v0 = vld [vmem:[%s225_s18] sm:$0xf] (%p1252_p10)  ;;  %v243_v1 = vld [vmem:[%s225_s18 + $0x8] sm:$0xf] (%p1252_p10) }
  0x4d   : > { %242 = vst [vmem:[%s221_s17] sm:$0xf] (%p1252_p10), %v241_v0  ;;  %244 = vst [vmem:[%s221_s17 + $0x4] sm:$0xf] (%p1252_p10), %v243_v1 }
  0x4e PF: > { %s272_s27 = sand.u32 1, %s907_s20   ;;  %s634_s6 = sshll.u32 %s923_s24, 2 }
  0x4f   : > { %s633_s11 = sshll.u32 %s272_s27, 3  ;;  %s281_s12 = sadd.s32 %s919_s23, %s634_s6 }
  0x50   : > { %s635_s28 = sshll.u32 %s281_s12, 6  ;;  %s276_s29 = scalar_lea.vmem [#allocation3], %s633_s11 }
  0x51   : > { %s284_s16 = sshll.u32 %s276_s29, 4  ;;  %s1102_s14 = scalar_lea.hbm %s1223_s1, %s635_s28  ;;  %s1104_s16 = int_to_ptr.vmem [resolvable:$true] %s284_s16 }
  0x52   : > { %s1106_s18 = scalar_lea.sflag [#allocation4], %s272_s27  ;;  %s797_s30 = scalar_lea.hbm %s1102_s14, 128 }
  0x53   : > { %p798_p3 = scmp.ne.s32.totalorder %s1102_s14, %s797_s30  ;;  %p1253_p6 = scmp.ne.s32.totalorder %s1241_s7, 0 }
  0x54   : > { %s801_s6 = scalar_lea.hbm %s1223_s1, 512  ;;  %p802_p13 = scmp.lt.u32.totalorder %s1102_s14, %s1223_s1 }
  0x55   : > { %p799_p8 = pnand %p798_p3, %p1253_p6  ;;  %p803_p2 = scmp.lt.u32.totalorder %s801_s6, %s797_s30 }
  0x56   : > { %p805_p7 = scmp.lt.u32.totalorder %s797_s30, %s1102_s14 }
  0x57   : > { %p800_p9 = pneg %p799_p8  ;;  %p804_p4 = por %p803_p2, %p802_p13 }
  0x59   : > { %p806_p11 = por %p805_p7, %p804_p4 }
  0x5b   : > { %p807_p12 = pnand %p806_p11, %p800_p9 }
  0x5d   : > { %810 = shalt.err (!%p807_p12)
}
  0x5e   : > { %s811_s27 = scalar_lea.vmem %s1104_s16, 128  ;;  %s932_s12 = smov [#allocation3]  }
  0x5f   : > { %p812_p0 = scmp.ne.s32.totalorder %s1104_s16, %s811_s27  ;;  %s815_s28 = sshll.u32 %s932_s12, 4  ;;  %s816_s28 = int_to_ptr.vmem [resolvable:$false] %s815_s28 }
  0x60   : > { %s817_s29 = scalar_lea.vmem %s816_s28, 256  ;;  %p818_p10 = scmp.lt.s32.totalorder %s1104_s16, %s816_s28 }
  0x61   : > { %p813_p1 = pnand %p812_p0, %p1253_p6  ;;  %p819_p3 = scmp.lt.s32.totalorder %s817_s29, %s811_s27 }
  0x63   : > { %p814_p5 = pneg %p813_p1  ;;  %p820_p8 = por %p819_p3, %p818_p10 }
  0x65   : > { %p821_p13 = pnand %p820_p8, %p814_p5 }
  0x67   : > { %824 = shalt.err (!%p821_p13)
}
  0x68   : > { %s933_s13 = smov 128   ;;  %s934_s30 = smov 64  }
  0x69   : > { %s935_s26 = smov 4  }
  0x6a   : > { %670 = dma.hbm_to_vmem [thread:$0]  (%p1253_p6), %s1102_s14, 128, %s1104_s16, %s1106_s18, %s933_s13, %s934_s30, %s935_s26  }
  0x6b PF: > { %p1254_p9 = scmp.ne.s32.totalorder %s1249_s15, 0 }
  0x6c   : > { %s1133_s17 = sand.u32 (!%p1254_p9), 1, %s903_s19   ;;  %p1255_p2 = scmp.ne.s32.totalorder (!%p1254_p9), %s1244_s9, 0 }
  0x6d   : > { %296 = sbr.rel (%p1254_p9) target bundleno = 359 (0x167), region = 77  ;;  %s637_s6 = sshll.u32 (!%p1254_p9), %s1133_s17, 3 }
  0x6e   : > { %s301_s3 = scalar_lea.vmem (!%p1254_p9), [#allocation2], %s637_s6  ;;  %s306_s11 = scalar_lea.sflag (!%p1254_p9), [#allocation4], %s1133_s17 }
  0x6f   : > { %s309_s27 = scalar_lea.vmem (!%p1254_p9), [#allocation3], %s637_s6 }
  0x74   : > { %886 = dma.done.wait (%p1255_p2), %s306_s11, 128  }
  0x75   : > { %888 = vsyncadd (%p1255_p2), %s306_s11, 4294967168  ;;  %p1256_p6 = scmp.ne.s32.totalorder %s1242_s8, 0 }
  0x77   : > { %890 = dma.done.wait (%p1256_p6), [#allocation7], 128  }
  0x78   : > { %892 = vsyncadd (%p1256_p6), [#allocation7], 4294967168  ;;  %v936_v2 = vmov 0.0   ;;  %vm937_vm0 = vmmov 0   ;;  %v938_v3 = vmov 0   ;;  %v765_v4 = vld [vmem:[%s301_s3] sm:$0xff]  }
  0x79   : > { %656 = vmatprep.subr.bf16.mxu0 %v936_v2  ;;  %662 = vmatprep.subr.bf16.mxu1 %v936_v2  ;;  %v766_v5 = vld [vmem:[%s309_s27] sm:$0xff]   ;;  %v767_v6 = vld [vmem:[%s1224_s2] sm:$0xff]   ;;  %vm378_vm1 = vcmask 130048   ;;  %v346_v11 = vld [vmem:[%s1226_s4 + $0x8] sm:$0xff]  ;;  %s640_s13 = sshll.u32 %s1133_s17, 5  ;;  %s648_s30 = sshll.u32 %s915_s22, 3 }
  0x7a   : > { %658 = vmatprep.mubr.msk.bf16.mxu0 %vm937_vm0, %v936_v2  ;;  %664 = vmatprep.mubr.msk.bf16.mxu1 %vm937_vm0, %v936_v2  ;;  %v768_v7 = vld [vmem:[#allocation6] sm:$0xff]   ;;  %v347_v8 = vld [vmem:[%s1226_s4 + $0x10] sm:$0xff]  ;;  %v348_v10 = vld [vmem:[%s1226_s4 + $0x18] sm:$0xff]  ;;  %s504_s26 = sadd.s32 %s911_s21, %s648_s30  ;;  %s343_s6 = scalar_lea.vmem [#allocation8], %s640_s13 }
  0x7b   : > { %764 = vset.pattern.permute.xlu1 %v938_v3  ;;  %763 = vset.pattern.permute.xlu0 %v938_v3  ;;  %v345_v9 = vld [vmem:[%s1226_s4] sm:$0xff]  ;;  %s507_s3 = sshll.u32 %s343_s6, 4  ;;  %s649_s11 = sshll.u32 %s504_s26, 7  ;;  %s1163_s3 = int_to_ptr.vmem [resolvable:$true] %s507_s3 }
  0x7c   : > { %657 = vmatpush3.bf16.msra.mxu0 %v765_v4  ;;  %663 = vmatpush3.bf16.msra.mxu1 %v766_v5  ;;  %s1168_s27 = scalar_lea.hbm %s1227_s5, %s649_s11  ;;  %s493_s7 = scalar_lea.sflag [#allocation5], %s1133_s17 }
  0x7d   : > { %427 = vperm.xlu1 %764, %v347_v8   ;;  %359 = vperm.xlu0 %763, %v345_v9   ;;  %s825_s9 = scalar_lea.vmem %s1163_s3, 512  ;;  %p1257_p7 = scmp.ne.s32.totalorder %s1245_s10, 0 }
  0x7e   : > { %p826_p4 = scmp.ne.s32.totalorder %s1163_s3, %s825_s9  ;;  %s939_s8 = smov [#allocation8]  }
  0x7f   : > { %659 = vmatmul.mubr.msk.bf16.vlgmr.msra.gmra.mrb[0].mxu0 %vm378_vm1, %v767_v6  ;;  %665 = vmatmul.mubr.msk.bf16.vlgmr.msra.gmra.mrb[0].mxu1 %vm378_vm1, %v768_v7  ;;  %s829_s15 = sshll.u32 %s939_s8, 4  ;;  %s830_s15 = int_to_ptr.vmem [resolvable:$false] %s829_s15 }
  0x80   : > { %p827_p11 = pnand %p826_p4, %p1257_p7  ;;  %s831_s16 = scalar_lea.vmem %s830_s15, 1024 }
  0x81   : > { %432 = vperm.xlu1 %764, %v348_v10   ;;  %364 = vperm.xlu0 %763, %v346_v11   ;;  %p832_p0 = scmp.lt.s32.totalorder %s1163_s3, %s830_s15  ;;  %p833_p1 = scmp.lt.s32.totalorder %s831_s16, %s825_s9 }
  0x82   : > { %p828_p12 = pneg %p827_p11 }
  0x83   : > { %p834_p5 = por %p833_p1, %p832_p0 }
  0x85   : > { %p835_p10 = pnand %p834_p5, %p828_p12 }
  0xfc   : > { %v428_v12 = vpop.permute.xlu1 %427  ;;  %v360_v13 = vpop.permute.xlu0 %359 }
 0x100   : > { %v433_v14 = vpop.permute.xlu1 %432  ;;  %v365_v15 = vpop.permute.xlu0 %364 }
 0x152   : > { %v416_v16 = vpop.f32.mrb[0].mxu0  ;;  %v483_v18 = vpop.f32.mrb[0].mxu1 }
 0x153   : > { %v417_v17 = vadd.f32 %v416_v16, %v360_v13  ;;  %v660_v19 = vpop.f32.mrb[1].mxu0  ;;  %v484_v20 = vadd.f32 %v483_v18, %v428_v12  ;;  %v666_v21 = vpop.f32.mrb[1].mxu1 }
 0x154   : > { %v419_v22 = vpop.f32.mrb[2].mxu0  ;;  %v486_v24 = vpop.f32.mrb[2].mxu1 }
 0x155   : > { %423 = vst [vmem:[%s343_s6] sm:$0xff] %v417_v17  ;;  %v420_v23 = vadd.f32 %v419_v22, %v365_v15  ;;  %v661_v25 = vpop.f32.mrb[3].mxu0  ;;  %490 = vst [vmem:[%s343_s6 + $0x10] sm:$0xff] %v484_v20  ;;  %v487_v26 = vadd.f32 %v486_v24, %v433_v14  ;;  %v667_v27 = vpop.f32.mrb[3].mxu1 }
 0x157   : > { %424 = vst [vmem:[%s343_s6 + $0x8] sm:$0xff] %v420_v23  ;;  %491 = vst [vmem:[%s343_s6 + $0x18] sm:$0xff] %v487_v26 }
 0x158   : > { %838 = shalt.err (!%p835_p10)
}
 0x159   : > { %s839_s14 = scalar_lea.hbm %s1168_s27, 512  ;;  %s843_s28 = scalar_lea.hbm %s1227_s5, 2048 }
 0x15a   : > { %p840_p3 = scmp.ne.s32.totalorder %s1168_s27, %s839_s14  ;;  %p844_p9 = scmp.lt.u32.totalorder %s1168_s27, %s1227_s5 }
 0x15b   : > { %p845_p2 = scmp.lt.u32.totalorder %s843_s28, %s839_s14  ;;  %p847_p4 = scmp.lt.u32.totalorder %s839_s14, %s1168_s27 }
 0x15c   : > { %p841_p8 = pnand %p840_p3, %p1257_p7 }
 0x15d   : > { %p846_p6 = por %p845_p2, %p844_p9 }
 0x15e   : > { %p842_p13 = pneg %p841_p8 }
 0x15f   : > { %p848_p11 = por %p847_p4, %p846_p6 }
 0x161   : > { %p849_p12 = pnand %p848_p11, %p842_p13 }
 0x163   : > { %852 = shalt.err (!%p849_p12)
}
 0x164   : > { %s940_s30 = smov 128   ;;  %s941_s26 = smov 256  }
 0x165   : > { %s942_s6 = smov 8  }
 0x166   : > { %674 = dma.vmem_to_hbm [thread:$0]  (%p1257_p7), %s1163_s3, 512, %s1168_s27, %s493_s7, %s940_s30, %s941_s26, %s942_s6  }
 0x167 PF: > { %s1258_s11 = sld [smem:[#allocation12_spill]]  ;;  %s1259_s21 = sld [smem:[#allocation15_spill]] }
 0x168   : > { %p686_p0 = scmp.ge.s32.totalorder %s927_s25, 2 }
 0x16d   : > { %s522_s22 = sand.u32 1, %s1258_s11   ;;  %p1260_p1 = scmp.ne.s32.totalorder %s1259_s21, 0 }
 0x16e   : > { %s523_s9 = scalar_lea.sflag [#allocation5], %s522_s22 }
 0x16f   : > { %p681_p5 = pnand %p686_p0, %p1260_p1 }
 0x171   : > { %894 = dma.done.wait (!%p681_p5), %s523_s9, 512  }
 0x172   : > { %896 = vsyncadd (!%p681_p5), %s523_s9, 4294966784  ;;  %s22_s25 = sadd.s32 1, %s927_s25   ;;  %s1261_s8 = sld [smem:[#allocation16_spill]] }
 0x173   : > { %p19_p10 = scmp.ge.s32.totalorder %s22_s25, 6   ;;  %s1262_s10 = sld [smem:[#allocation13_spill]] }
 0x174   : > { %s1263_s17 = sld [smem:[#allocation14_spill]]  ;;  %s1264_s18 = smov %s903_s19 }
 0x175   : > { %s1265_s19 = smov %s907_s20  ;;  %s1267_s21 = smov %s919_s23 }
 0x176   : > { %s1268_s22 = smov %s923_s24  ;;  %21 = sbr.rel (!%p19_p10) target bundleno = 10 (0xa), region = 138 }
 0x178   : > { %s1266_s20 = smov %s1261_s8 }
 0x179   : > { %s1269_s23 = smov %s1262_s10 }
 0x17a   : > { %s1270_s24 = smov %s1263_s17 }
 0x17d   :  { %528 = vsyncpa [#allocation4], 1 }
 0x17e   :  { %530 = vsyncpa [#allocation4 + $0x1], 1 }
 0x17f   :  { %531 = vsyncpa [#allocation7], 1 }
 0x180   :  { %532 = vsyncpa [#allocation5], 1 }
 0x181   :  { %534 = vsyncpa [#allocation5 + $0x1], 1 }

</bundles_post_ra>
